<compile_context>
chip_gen: v7x
topology: tpu7x:2x2x1
jax: 0.10.0
libtpu: 0.0.40
codegen_flags: <defaults>
</compile_context>

<pallas_src>
import functools

import jax
import jax.numpy as jnp
from jax.experimental import pallas as pl
from jax.experimental.pallas import tpu as pltpu


def _att_kernel(x_ref, mask_ref, wqkv_ref, bqkv_ref, out_ref, *, B, N, H):
    """Single-invocation kernel: all refs are whole arrays resident in VMEM.

    x_ref:    (B*N, din)   f32
    mask_ref: (B, N, N)    f32 (binary)
    wqkv_ref: (din, 3H)    f32   [q | k | v] concatenated along the output dim
    bqkv_ref: (1, 3H)      f32
    out_ref:  (B*N, H)     f32
    """
    x = x_ref[...]                                            # (B*N, din)

    # Fused Q/K/V projection: one MXU matmul, one bias broadcast, one ReLU.
    qkv = jnp.dot(x, wqkv_ref[...], preferred_element_type=jnp.float32)
    qkv = jnp.maximum(qkv + bqkv_ref[...], 0.0)               # (B*N, 3H)

    # Leading-dim split (layout-compatible, free) + static lane slices.
    qkv = qkv.reshape(B, N, 3 * H)
    q = qkv[:, :, :H]                                         # (B, N, H)
    k = qkv[:, :, H:2 * H]                                    # (B, N, H)
    v = qkv[:, :, 2 * H:]                                     # (B, N, H)

    # Attention logits: contract last dims directly (no k transpose).
    logits = jnp.einsum("bqh,bkh->bqk", q, k,
                        preferred_element_type=jnp.float32)   # (B, N, N)

    # Binary mask: select is numerically identical to
    # logits * m - 9e15 * (1 - m) for m in {0, 1}.
    m = mask_ref[...]
    logits = jnp.where(m != 0, logits, -9000000000000000.0)

    # Row-wise numerically-stabilized softmax (matches torch semantics).
    logits = logits - jnp.max(logits, axis=-1, keepdims=True)
    e = jnp.exp(logits)
    # Exact reciprocal: approx=True (EUP vrcp) could exceed the 1e-4 tolerance.
    att = e * pl.reciprocal(jnp.sum(e, axis=-1, keepdims=True), approx=False)

    # Weighted sum of values; store as one contiguous (B*N, H) slab.
    out = jnp.einsum("bqk,bkh->bqh", att, v,
                     preferred_element_type=jnp.float32)      # (B, N, H)
    out_ref[...] = out.reshape(B * N, H).astype(out_ref.dtype)


def att_model_forward(x, mask, params):
    """x: (B, N, din) f32, mask: (B, N, N) f32, params: dict of weights/biases.

    Weights are stored as (din, hidden); biases as (hidden,).
    """
    B, N, din = x.shape
    H = params["wv"].shape[1]

    # Fuse the three projections into one weight / bias (order: q, k, v).
    wqkv = jnp.concatenate([params["wq"], params["wk"], params["wv"]], axis=1)
    bqkv = jnp.concatenate(
        [params["bq"], params["bk"], params["bv"]]).reshape(1, 3 * H)

    x_flat = x.reshape(B * N, din)

    kernel = functools.partial(_att_kernel, B=B, N=N, H=H)
    vmem = pl.BlockSpec(memory_space=pltpu.MemorySpace.VMEM)

    out_flat = pl.pallas_call(
        kernel,
        out_shape=jax.ShapeDtypeStruct((B * N, H), x.dtype),
        in_specs=[vmem, vmem, vmem, vmem],
        out_specs=vmem,
    )(x_flat, mask, wqkv, bqkv)

    return out_flat.reshape(B, N, H)


def _reference(x, mask, params):
    """Pure-JAX reference using the exact torch formula."""
    def lin(x, w, b):
        return jax.nn.relu(jnp.einsum("bnd,dh->bnh", x, w) + b)
    v = lin(x, params["wv"], params["bv"])
    q = lin(x, params["wq"], params["bq"])
    k = lin(x, params["wk"], params["bk"])
    logits = jnp.einsum("bnh,bmh->bnm", q, k) * mask - 9e15 * (1.0 - mask)
    att = jax.nn.softmax(logits, axis=2)
    return jnp.einsum("bnm,bmh->bnh", att, v)


if __name__ == "__main__":
    B, N, din, hidden = 2, 8, 32, 32

    key = jax.random.PRNGKey(0)
    ks = jax.random.split(key, 9)

    # Deterministic synthetic parameters (weights stored as (din, hidden)).
    scale = 1.0 / jnp.sqrt(jnp.float32(din))
    params = {
        "wv": jax.random.uniform(ks[0], (din, hidden), jnp.float32, -scale, scale),
        "bv": jax.random.uniform(ks[1], (hidden,), jnp.float32, -scale, scale),
        "wq": jax.random.uniform(ks[2], (din, hidden), jnp.float32, -scale, scale),
        "bq": jax.random.uniform(ks[3], (hidden,), jnp.float32, -scale, scale),
        "wk": jax.random.uniform(ks[4], (din, hidden), jnp.float32, -scale, scale),
        "bk": jax.random.uniform(ks[5], (hidden,), jnp.float32, -scale, scale),
    }

    x = jax.random.normal(ks[6], (B, N, din), jnp.float32)
    # Binary adjacency-style mask with self-connections guaranteed
    # (no fully-masked rows, matching typical usage of this module).
    mask = (jax.random.uniform(ks[7], (B, N, N)) > 0.5).astype(jnp.float32)
    mask = jnp.maximum(mask, jnp.eye(N, dtype=jnp.float32)[None])

    out = att_model_forward(x, mask, params)
    out = jax.block_until_ready(out)

    ref = _reference(x, mask, params)
    assert out.shape == (B, N, hidden)
    assert jnp.allclose(out, ref, atol=1e-4, rtol=1e-4), "mismatch vs pure-JAX reference"

    print("KERNEL_OK")
</pallas_src>

<mosaic_0001>
module attributes {stable_mosaic.version = 11 : i64} {
  func.func @_att_kernel(%arg0: memref<16x32xf32, #tpu.memory_space<vmem>>, %arg1: memref<2x8x8xf32, #tpu.memory_space<vmem>>, %arg2: memref<32x96xf32, #tpu.memory_space<vmem>>, %arg3: memref<1x96xf32, #tpu.memory_space<vmem>>, %arg4: memref<16x32xf32, #tpu.memory_space<vmem>>) attributes {dimension_semantics = [], scalar_prefetch = 0 : i64, scratch_operands = 0 : i64, tpu.core_type = #tpu.core_type<tc>} {
    %c0 = arith.constant 0 : index
    %c0_0 = arith.constant 0 : index
    %0 = vector.load %arg0[%c0, %c0_0] : memref<16x32xf32, #tpu.memory_space<vmem>>, vector<16x32xf32>
    %c0_1 = arith.constant 0 : index
    %c0_2 = arith.constant 0 : index
    %1 = vector.load %arg2[%c0_1, %c0_2] : memref<32x96xf32, #tpu.memory_space<vmem>>, vector<32x96xf32>
    %cst = arith.constant dense<0.000000e+00> : vector<16x96xf32>
    %2 = tpu.matmul %0, %1, %cst {dimension_numbers = #tpu.dot_dimension_numbers<[1], [0], [0], [1], [0, 0, 1, 1], [], []>} : vector<16x32xf32>, vector<32x96xf32>, vector<16x96xf32> -> vector<16x96xf32>
    %c0_3 = arith.constant 0 : index
    %c0_4 = arith.constant 0 : index
    %3 = vector.load %arg3[%c0_3, %c0_4] : memref<1x96xf32, #tpu.memory_space<vmem>>, vector<1x96xf32>
    %4 = vector.broadcast %3 : vector<1x96xf32> to vector<16x96xf32>
    %5 = arith.addf %2, %4 : vector<16x96xf32>
    %cst_5 = arith.constant 0.000000e+00 : f32
    %6 = vector.broadcast %cst_5 : f32 to vector<16x96xf32>
    %7 = arith.maximumf %5, %6 : vector<16x96xf32>
    %8 = vector.shape_cast %7 : vector<16x96xf32> to vector<2x8x96xf32>
    %9 = vector.extract_strided_slice %8 {offsets = [0, 0, 0], sizes = [2, 8, 32], strides = [1, 1, 1]} : vector<2x8x96xf32> to vector<2x8x32xf32>
    %10 = vector.extract_strided_slice %8 {offsets = [0, 0, 32], sizes = [2, 8, 32], strides = [1, 1, 1]} : vector<2x8x96xf32> to vector<2x8x32xf32>
    %11 = vector.extract_strided_slice %8 {offsets = [0, 0, 64], sizes = [2, 8, 32], strides = [1, 1, 1]} : vector<2x8x96xf32> to vector<2x8x32xf32>
    "tpu.trace_start"() <{level = 10 : i32, message = "bqh,bkh->bqk"}> : () -> ()
    %cst_6 = arith.constant dense<0.000000e+00> : vector<2x8x8xf32>
    %12 = tpu.matmul %9, %10, %cst_6 {dimension_numbers = #tpu.dot_dimension_numbers<[2], [2], [1], [1], [0, 0, 0, 1, 1, 1], [0], [0]>} : vector<2x8x32xf32>, vector<2x8x32xf32>, vector<2x8x8xf32> -> vector<2x8x8xf32>
    "tpu.trace_stop"() : () -> ()
    %c0_7 = arith.constant 0 : index
    %c0_8 = arith.constant 0 : index
    %c0_9 = arith.constant 0 : index
    %13 = vector.load %arg1[%c0_7, %c0_8, %c0_9] : memref<2x8x8xf32, #tpu.memory_space<vmem>>, vector<2x8x8xf32>
    %cst_10 = arith.constant 0.000000e+00 : f32
    %14 = vector.broadcast %cst_10 : f32 to vector<2x8x8xf32>
    %15 = arith.cmpf one, %13, %14 : vector<2x8x8xf32>
    %cst_11 = arith.constant -9.000000e+15 : f32
    %16 = vector.broadcast %cst_11 : f32 to vector<2x8x8xf32>
    %17 = arith.select %15, %12, %16 : vector<2x8x8xi1>, vector<2x8x8xf32>
    %cst_12 = arith.constant dense<0xFF800000> : vector<2x8xf32>
    %18 = vector.multi_reduction <maximumf>, %17, %cst_12 [2] : vector<2x8x8xf32> to vector<2x8xf32>
    %19 = vector.shape_cast %18 : vector<2x8xf32> to vector<2x8x1xf32>
    %20 = vector.broadcast %19 : vector<2x8x1xf32> to vector<2x8x8xf32>
    %21 = arith.subf %17, %20 : vector<2x8x8xf32>
    %22 = math.exp %21 : vector<2x8x8xf32>
    %cst_13 = arith.constant dense<0.000000e+00> : vector<2x8xf32>
    %23 = vector.multi_reduction <add>, %22, %cst_13 [2] : vector<2x8x8xf32> to vector<2x8xf32>
    %24 = vector.shape_cast %23 : vector<2x8xf32> to vector<2x8x1xf32>
    %25 = tpu.reciprocal %24 : vector<2x8x1xf32> -> vector<2x8x1xf32>
    %26 = vector.broadcast %25 : vector<2x8x1xf32> to vector<2x8x8xf32>
    %27 = arith.mulf %22, %26 : vector<2x8x8xf32>
    "tpu.trace_start"() <{level = 10 : i32, message = "bqk,bkh->bqh"}> : () -> ()
    %cst_14 = arith.constant dense<0.000000e+00> : vector<2x8x32xf32>
    %28 = tpu.matmul %27, %11, %cst_14 {dimension_numbers = #tpu.dot_dimension_numbers<[2], [1], [1], [2], [0, 0, 0, 1, 1, 2], [0], [0]>} : vector<2x8x8xf32>, vector<2x8x32xf32>, vector<2x8x32xf32> -> vector<2x8x32xf32>
    "tpu.trace_stop"() : () -> ()
    %29 = vector.shape_cast %28 : vector<2x8x32xf32> to vector<16x32xf32>
    %c0_15 = arith.constant 0 : index
    %c0_16 = arith.constant 0 : index
    %30 = vector.load %arg4[%c0_15, %c0_16] : memref<16x32xf32, #tpu.memory_space<vmem>>, vector<16x32xf32>
    tpu.vector_store %arg4[%c0_15, %c0_16], %29 {strides = array<i32>} : memref<16x32xf32, #tpu.memory_space<vmem>>, vector<16x32xf32>,
    return
  }
}

</mosaic_0001>

<bundles_post_ra>
// kernel: tpu_custom_call.1
= control target key start
LH: loop header
LB: loop body
LE: loop exit
PB: predicated region body
PF: predicated region fallthrough
CT: control target
= control target key end

     0   :  { %9 = vsyncpa [#allocation3], 0  ;;  %s808_s0 = inlined_call_operand.hbm [shape: f32[16,32], index: 0, kind: input, shape index: {}]   ;;  %s809_s1 = inlined_call_operand.hbm [shape: f32[2,8,8], index: 1, kind: input, shape index: {}]   ;;  %s810_s2 = inlined_call_operand.hbm [shape: f32[32,96], index: 2, kind: input, shape index: {}]   ;;  %s811_s3 = inlined_call_operand.vmem [shape: f32[1,96], index: 3, kind: input, shape index: {}]   ;;  %s812_s4 = inlined_call_operand.hbm [shape: f32[16,32], index: 4, kind: output, shape index: {}]  }
   0x1   :  { %10 = vsyncpa [#allocation6], 0 }
   0x2   :  { %11 = vsyncpa [#allocation4], 0  ;;  %s685_s15 = smov [#allocation5]   ;;  %s686_s17 = smov [#allocation2]  }
   0x3   :  { %s29_s16 = sshll.u32 %s685_s15, 4  ;;  %s17_s18 = sshll.u32 %s686_s17, 4  ;;  %s30_s16 = int_to_ptr.vmem [resolvable:$true] %s29_s16  ;;  %s720_s18 = int_to_ptr.vmem [resolvable:$true] %s17_s18 }
   0x4   :  { %s591_s21 = scalar_lea.hbm %s809_s1, 256 }
   0x5   :  { %p592_p0 = scmp.ne.s32.totalorder %s809_s1, %s591_s21  ;;  %p595_p1 = scmp.lt.u32.totalorder %s591_s21, %s809_s1 }
   0x7   :  { %p597_p2 = pnand %p595_p1, %p592_p0 }
   0x9   :  { %600 = shalt.err (!%p597_p2)
}
   0xa   :  { %s601_s26 = scalar_lea.vmem %s30_s16, 256  ;;  %p606_p4 = scmp.lt.s32.totalorder %s30_s16, %s30_s16 }
   0xb   :  { %p602_p3 = scmp.ne.s32.totalorder %s30_s16, %s601_s26  ;;  %p607_p5 = scmp.lt.s32.totalorder %s601_s26, %s601_s26 }
   0xd   :  { %p608_p6 = por %p607_p5, %p606_p4 }
   0xf   :  { %p609_p7 = pnand %p608_p6, %p602_p3 }
  0x11   :  { %612 = shalt.err (!%p609_p7)
}
  0x12   :  { %s687_s27 = smov 128   ;;  %s688_s28 = smov 8  }
  0x13   :  { %35 = dma.hbm_to_vmem [thread:$0]  %s809_s1, 256, %s30_s16, [#allocation6], %s687_s27, %s687_s27, %s688_s28  }
  0x14   :  { %s613_s7 = scalar_lea.hbm %s808_s0, 256 }
  0x15   :  { %p614_p8 = scmp.ne.s32.totalorder %s808_s0, %s613_s7  ;;  %p617_p9 = scmp.lt.u32.totalorder %s613_s7, %s808_s0 }
  0x17   :  { %p619_p10 = pnand %p617_p9, %p614_p8 }
  0x19   :  { %622 = shalt.err (!%p619_p10)
}
  0x1a   :  { %s623_s12 = scalar_lea.vmem %s720_s18, 256  ;;  %p628_p12 = scmp.lt.s32.totalorder %s720_s18, %s720_s18 }
  0x1b   :  { %p624_p11 = scmp.ne.s32.totalorder %s720_s18, %s623_s12  ;;  %p629_p13 = scmp.lt.s32.totalorder %s623_s12, %s623_s12 }
  0x1d   :  { %p630_p0 = por %p629_p13, %p628_p12 }
  0x1f   :  { %p631_p1 = pnand %p630_p0, %p624_p11 }
  0x21   :  { %634 = shalt.err (!%p631_p1)
}
  0x22   :  { %23 = dma.hbm_to_vmem [thread:$0]  %s808_s0, 256, %s720_s18, [#allocation3], %s687_s27, %s687_s27, %s688_s28  }
  0x23   :  { %s689_s14 = smov [#allocation7]   ;;  %s635_s19 = scalar_lea.hbm %s810_s2, 512 }
  0x24   :  { %s41_s15 = sshll.u32 %s689_s14, 4  ;;  %p636_p2 = scmp.ne.s32.totalorder %s810_s2, %s635_s19  ;;  %s42_s15 = int_to_ptr.vmem [resolvable:$true] %s41_s15 }
  0x25   :  { %p639_p3 = scmp.lt.u32.totalorder %s635_s19, %s810_s2 }
  0x27   :  { %p641_p4 = pnand %p639_p3, %p636_p2 }
  0x29   :  { %644 = shalt.err (!%p641_p4)
}
  0x2a   :  { %s645_s24 = scalar_lea.vmem %s42_s15, 512  ;;  %p650_p6 = scmp.lt.s32.totalorder %s42_s15, %s42_s15 }
  0x2b   :  { %p646_p5 = scmp.ne.s32.totalorder %s42_s15, %s645_s24  ;;  %p651_p7 = scmp.lt.s32.totalorder %s645_s24, %s645_s24 }
  0x2d   :  { %p652_p8 = por %p651_p7, %p650_p6 }
  0x2f   :  { %p653_p9 = pnand %p652_p8, %p646_p5 }
  0x31   :  { %656 = shalt.err (!%p653_p9)
}
  0x32   :  { %47 = dma.hbm_to_vmem [thread:$0]  %s810_s2, 512, %s42_s15, [#allocation6], %s687_s27, %s687_s27, %s688_s28  }
  0x33   :  { %679 = dma.done.wait [#allocation3], 256  }
  0x34   :  { %680 = vsyncadd [#allocation3], 4294967040 }
  0x35   :  { %681 = dma.done.wait [#allocation6], 768  }
  0x36   :  { %682 = vsyncadd [#allocation6], 4294966528  ;;  %vm72_vm0 = vcmask 261120   ;;  %v61_v0 = vld [vmem:[#allocation7] sm:$0xff]  ;;  %v62_v1 = vld [vmem:[#allocation7 + $0x8] sm:$0xff]  ;;  %v690_v8 = vmov 0.0  }
  0x37   :  { %v63_v2 = vld [vmem:[#allocation7 + $0x10] sm:$0xff]  ;;  %v565_v3 = vpack.c.bf16 %v62_v1, %v61_v0  ;;  %v64_v4 = vld [vmem:[#allocation7 + $0x18] sm:$0xff]  ;;  %v59_v5 = vld [vmem:[#allocation2] sm:$0xff]  ;;  %545 = vmatprep.subr.mxu1 %v690_v8  ;;  %vm691_vm1 = vmmov 0   ;;  %s692_s26 = smov 96   ;;  %vm316_vm3 = vcmask 64512  }
  0x38   :  { %v569_v6 = vpack.c.bf16 %v64_v4, %v63_v2  ;;  %542 = vmatprep.mubr.msk.f32.mxu0 %vm72_vm0, %v59_v5  ;;  %v60_v7 = vld [vmem:[#allocation2 + $0x8] sm:$0xff]  ;;  %547 = vmatprep.mubr.msk.f32.mxu1 %vm691_vm1, %v690_v8  ;;  %v511_v9 = vld [vmem:[%s811_s3] ss:$0 sm:$0xff]  ;;  %v310_v18 = vld [vmem:[#allocation5] sm:$0xff]  ;;  %s693_s3 = smov 64   ;;  %s694_s29 = smov [#allocation8]  }
  0x39   :  { %566 = vmatprep.subr.bf16.mxu0 %v565_v3  ;;  %vm312_vm2 = vcmp.ne.f32.partialorder %v310_v18, 0.0  ;;  %v311_v19 = vld [vmem:[#allocation5 + $0x8] sm:$0xff]  ;;  %s498_s30 = sshll.u32 %s694_s29, 4  ;;  %s499_s30 = int_to_ptr.vmem [resolvable:$true] %s498_s30 }
  0x3a   :  { %568 = vmatpush3.bf16.msra.mxu0 %v565_v3  ;;  %vm313_vm4 = vcmp.ne.f32.partialorder %v311_v19, 0.0  ;;  %s657_s5 = scalar_lea.vmem %s499_s30, 256  ;;  %p662_p11 = scmp.lt.s32.totalorder %s499_s30, %s499_s30 }
  0x3b   :  { %570 = vmatprep.subr.bf16.mxu0 %v569_v6  ;;  %p658_p10 = scmp.ne.s32.totalorder %s499_s30, %s657_s5  ;;  %p663_p12 = scmp.lt.s32.totalorder %s657_s5, %s657_s5 }
  0x3d   :  { %p664_p13 = por %p663_p12, %p662_p11 }
  0x3e   :  { %572 = vmatpush3.bf16.msra.mxu0 %v569_v6 }
  0x3f   :  { %555 = vmatprep.subr.mxu0 %v690_v8  ;;  %p665_p0 = pnand %p664_p13, %p658_p10 }
  0x41   :  { %543 = vmatmul.mubr.msk.f32.vlgmr.msra.gmra.mrb[0].mxu0 %vm72_vm0, %v60_v7 }
  0x42   :  { %557 = vmatprep.mubr.msk.f32.mxu0 %vm691_vm1, %v690_v8 }
 0x114   :  { %v544_v10 = vpop.f32.mrb[0].mxu0 }
 0x115   :  { %v145_v11 = vpop.f32.mrb[1].mxu0  ;;  %v151_v13 = vadd.f32 %v544_v10, %v511_v9 }
 0x116   :  { %v146_v12 = vadd.f32 %v511_v9, %v145_v11 }
 0x117   :  { %v155_v15 = vmax.f32 %v151_v13, 0.0 }
 0x118   :  { %v154_v14 = vmax.f32 %v146_v12, 0.0 }
 0x11a   :  { %157 = vrot.lane.b32.xlu0 %v154_v14, %s692_s26 }
 0x11e   :  { %234 = vrot.lane.b32.xlu0 %v155_v15, %s692_s26 }
 0x18c   :  { %v158_v16 = vpop.permute.xlu0 %157 }
 0x18d   :  { %546 = vmatpush3.xpose.msk.msra.mxu1 %vm72_vm0, %v158_v16 }
 0x18e   :  { %550 = vmatprep.subr.mxu1 %v690_v8 }
 0x190   :  { %548 = vmatmul.mubr.msk.f32.vlgmr.msra.gmra.mrb[0].mxu1 %vm72_vm0, %v154_v14  ;;  %v235_v17 = vpop.permute.xlu0 %234 }
 0x191   :  { %551 = vmatpush3.xpose.msk.msra.mxu1 %vm72_vm0, %v235_v17  ;;  %552 = vmatprep.mubr.msk.f32.mxu1 %vm691_vm1, %v690_v8 }
 0x192   :  { %560 = vmatprep.subr.mxu1 %v690_v8 }
 0x194   :  { %553 = vmatmul.mubr.msk.f32.vlgmr.msra.gmra.mrb[2].mxu1 %vm72_vm0, %v155_v15 }
 0x195   :  { %562 = vmatprep.mubr.msk.f32.mxu1 %vm691_vm1, %v690_v8 }
 0x263   :  { %v229_v20 = vpop.f32.mrb[0].mxu1 }
 0x264   :  { %v314_v21 = vsel %vm312_vm2, %v229_v20, -9e+15  ;;  %v549_v22 = vpop.f32.mrb[1].mxu1 }
 0x265   :  { %v317_v23 = vsel %vm316_vm3, %v314_v21, -inf }
 0x266   :  { %318 = vmax.xlane.f32.xlu1 %v317_v23 }
 0x267   :  { %v306_v24 = vpop.f32.mrb[2].mxu1 }
 0x268   :  { %v315_v25 = vsel %vm313_vm4, %v306_v24, -9e+15  ;;  %v554_v26 = vpop.f32.mrb[3].mxu1 }
 0x269   :  { %v320_v27 = vsel %vm316_vm3, %v315_v25, -inf }
 0x26a   :  { %321 = vmax.xlane.f32.xlu1 %v320_v27 }
 0x27b   :  { %339 = vrot.lane.b32.xlu1 %v154_v14, %s693_s3 }
 0x2f3   :  { %v319_v28 = vpop.xlane.xlu1 %318 }
 0x2f4   :  { %v323_v29 = vsub.f32 %v314_v21, %v319_v28 }
 0x2f6   :  { %v325_v30 = vmul.f32 1.442695, %v323_v29 }
 0x2f7   :  { %v322_v31 = vpop.xlane.xlu1 %321 }
 0x2f8   :  { %583 = vpow2.f32 %v325_v30  ;;  %v324_v32 = vsub.f32 %v315_v25, %v322_v31 }
 0x2fa   :  { %v327_v33 = vmul.f32 1.442695, %v324_v32 }
 0x2fb   :  { %v340_v34 = vpop.permute.xlu1 %339 }
 0x2fc   :  { %585 = vpow2.f32 %v327_v33  ;;  %556 = vmatpush3.msra.mxu0 %v340_v34 }
 0x302   :  { %v584_v35 = vpop.eup %583 }
 0x303   :  { %v329_v36 = vsel %vm316_vm3, %v584_v35, 0.0 }
 0x304   :  { %330 = vadd.xlane.f32.xlu0 %v329_v36 }
 0x306   :  { %v586_v37 = vpop.eup %585 }
 0x307   :  { %v332_v38 = vsel %vm316_vm3, %v586_v37, 0.0 }
 0x308   :  { %333 = vadd.xlane.f32.xlu1 %v332_v38 }
 0x319   :  { %415 = vrot.lane.b32.xlu1 %v155_v15, %s693_s3 }
 0x391   :  { %v331_v39 = vpop.xlane.xlu0 %330 }
 0x392   :  { %587 = vrcp.f32 %v331_v39 }
 0x395   :  { %v334_v40 = vpop.xlane.xlu1 %333 }
 0x396   :  { %589 = vrcp.f32 %v334_v40 }
 0x399   :  { %v416_v41 = vpop.permute.xlu1 %415 }
 0x39a   :  { %561 = vmatpush3.msra.mxu1 %v416_v41 }
 0x39c   :  { %v588_v42 = vpop.eup %587 }
 0x39d   :  { %v337_v43 = vmul.f32 %v588_v42, %v584_v35 }
 0x39f   :  { %558 = vmatmul.mubr.msk.f32.vlgmr.msra.gmra.mrb[2].mxu0 %vm316_vm3, %v337_v43 }
 0x3a0   :  { %v590_v44 = vpop.eup %589 }
 0x3a1   :  { %v338_v45 = vmul.f32 %v590_v44, %v586_v37 }
 0x3a3   :  { %563 = vmatmul.mubr.msk.f32.vlgmr.msra.gmra.mrb[4].mxu1 %vm316_vm3, %v338_v45 }
 0x472   :  { %v411_v46 = vpop.f32.mrb[2].mxu0 }
 0x473   :  { %491 = vst.msk [vmem:[#allocation8] sm:$0xff] %vm72_vm0, %v411_v46  ;;  %v559_v47 = vpop.f32.mrb[3].mxu0 }
 0x476   :  { %v487_v48 = vpop.f32.mrb[4].mxu1 }
 0x477   :  { %492 = vst.msk [vmem:[#allocation8 + $0x8] sm:$0xff] %vm72_vm0, %v487_v48  ;;  %v564_v49 = vpop.f32.mrb[5].mxu1 }
 0x478   :  { %668 = shalt.err (!%p665_p0)
}
 0x479   :  { %s669_s8 = scalar_lea.hbm %s812_s4, 256 }
 0x47a   :  { %p670_p1 = scmp.ne.s32.totalorder %s812_s4, %s669_s8  ;;  %p673_p2 = scmp.lt.u32.totalorder %s669_s8, %s812_s4 }
 0x47c   :  { %p675_p3 = pnand %p673_p2, %p670_p1 }
 0x47e   :  { %678 = shalt.err (!%p675_p3)
}
 0x47f   :  { %504 = dma.vmem_to_hbm [thread:$0]  %s499_s30, 256, %s812_s4, [#allocation4], %s687_s27, %s687_s27, %s688_s28  }
 0x480   :  { %683 = dma.done.wait [#allocation4], 256  }
 0x481   :  { %684 = vsyncadd [#allocation4], 4294967040 }
 0x482   :  { %508 = vsyncpa [#allocation3], 1 }
 0x483   :  { %509 = vsyncpa [#allocation6], 1 }
 0x484   :  { %510 = vsyncpa [#allocation4], 1 }

</bundles_post_ra>
